<compile_context>
chip_gen: v6e
topology: v6e:2x2x1
jax: 0.10.0
libtpu: 0.0.40
codegen_flags: <defaults>
</compile_context>

<pallas_src>
import functools
import math

import jax
import jax.numpy as jnp
from jax.experimental import pallas as pl
from jax.experimental.pallas import tpu as pltpu


# ----------------------------------------------------------------------- helpers
def _round_up(a, m):
    return ((a + m - 1) // m) * m


def _num_tensorcores():
    """TensorCores per chip (megacore awareness). Best-effort; defaults to 1."""
    try:
        info = pltpu.get_tpu_info()
        for name in ("num_cores", "core_count", "num_tensorcores", "tensorcores_per_chip"):
            v = getattr(info, name, None)
            if isinstance(v, int) and v > 0:
                return max(1, min(int(v), 2))
    except Exception:
        pass
    try:
        kind = jax.devices()[0].device_kind.lower()
        if "v7" in kind or "v4" in kind or "v3" in kind:
            return 2
    except Exception:
        pass
    return 1


def _vmem_capacity_bytes():
    """Physical VMEM per TensorCore (64 MiB on v7x, 128 MiB on v5e/v6e)."""
    try:
        cap = int(getattr(pltpu.get_tpu_info(), "vmem_capacity_bytes", 0) or 0)
        if cap > 0:
            return cap
    except Exception:
        pass
    try:
        if "v7" in jax.devices()[0].device_kind.lower():
            return 64 * 1024 * 1024
    except Exception:
        pass
    return 128 * 1024 * 1024


def _row_tiling(S, row_in_bytes, row_out_bytes, resident_bytes, budget, n_cores,
                bs_cap=512):
    """Pick (S_pad, block_rows, grid_len) under a VMEM byte budget.

    VMEM model (conservative): resident weights + double-buffered per-row in/out.
    Small S runs as one block on single-TC chips; split in two only on megacore.
    """
    avail = max(budget - resident_bytes, 1 * 1024 * 1024)
    per_row = max(row_in_bytes + row_out_bytes, 1)
    bs_mem = max(8, (avail // per_row) // 8 * 8)
    cap = int(min(bs_cap, bs_mem))
    s8 = _round_up(S, 8)
    if s8 <= cap:
        if n_cores >= 2 and s8 >= 16:
            bs = _round_up(-(-s8 // 2), 8)      # 2 blocks -> one per TensorCore
            return 2 * bs, bs, 2
        return S, S, 1                          # single block == full array
    bs = cap
    s_pad = _round_up(S, bs)
    return s_pad, bs, s_pad // bs


# ----------------------------------------------------------------------- kernels
def _gc_fused_kernel(x_ref, w_ref, o_ref, *, act, compute_dtype):
    # x_ref: (bs, N*Ci); w_ref: (N*Ci, N*Co_pad) fused adj (x) th weight.
    x = x_ref[...].astype(compute_dtype)   # cast in-kernel: no extra wrapper HBM pass
    out = jnp.dot(x, w_ref[...], preferred_element_type=jnp.float32)
    if act is not None:
        out = act(out)
    o_ref[...] = out.astype(o_ref.dtype)


def _gc_unfused_kernel(x_ref, adj_ref, th_ref, o_ref, *, act, compute_dtype, nodes_first):
    # x_ref: (bs, N, Ci); adj_ref: (N, N); th_ref: (Ci, Co_pad); o_ref: (bs, N, Co_pad).
    adj = adj_ref[...]
    th = th_ref[...]
    bs = x_ref.shape[0]

    @pl.loop(0, bs)
    def _(i):
        xi = x_ref[i].astype(compute_dtype)                       # (N, Ci)
        if nodes_first:   # adj contraction first (fewer FLOPs when Ci <= Co)
            y = jnp.dot(adj, xi, preferred_element_type=jnp.float32)              # (N, Ci)
            out = jnp.dot(y.astype(compute_dtype), th, preferred_element_type=jnp.float32)
        else:             # channel projection first (fewer FLOPs when Co < Ci)
            z = jnp.dot(xi, th, preferred_element_type=jnp.float32)               # (N, Co)
            out = jnp.dot(adj, z.astype(compute_dtype), preferred_element_type=jnp.float32)
        if act is not None:
            out = act(out)
        o_ref[i] = out.astype(o_ref.dtype)


# ----------------------------------------------------------------------- wrapper
def gc_forward(x, adj, th, act_func=None, *, compute_dtype=None,
               fuse_weight_limit_bytes=4 * 1024 * 1024):
    """x: (B, T, N, C_in), adj: (N, N), th: (C_in, C_out) -> (B, T, N, C_out)."""
    B, T, N, Ci = x.shape
    assert adj.shape == (N, N)
    assert th.shape[0] == Ci
    Co = th.shape[1]
    S = B * T

    out_dtype = x.dtype
    cdt = jnp.dtype(compute_dtype) if compute_dtype is not None else jnp.dtype(x.dtype)
    xb = jnp.dtype(x.dtype).itemsize
    cb = cdt.itemsize
    ob = jnp.dtype(out_dtype).itemsize

    n_cores = _num_tensorcores()
    vmem_cap = _vmem_capacity_bytes()
    budget = (vmem_cap * 3) // 4        # ~48 MiB on v7x, ~96 MiB on v5e/v6e
    slack = 2 * 1024 * 1024             # headroom for compiler-internal scratch
    act = act_func

    # --------------------- fused path (small problems only) ---------------------
    # Minimal Co padding that makes the flattened output last dim (N*Co_pad) a
    # multiple of 128 (lane-dense, unmasked stores).
    step = 128 // math.gcd(N, 128)
    co_pad_f = _round_up(Co, step)
    K = N * Ci
    Mf = N * co_pad_f
    fused_w_bytes = K * Mf * cb
    # Gate: only fold adj (x) th when the fused weight is small; guarantees it fits
    # VMEM on every generation (incl. v7x 64 MiB) and bounds the FLOP inflation.
    use_fused = fused_w_bytes <= min(fuse_weight_limit_bytes, budget // 4)

    if use_fused:
        th_p = th if co_pad_f == Co else jnp.pad(th, ((0, 0), (0, co_pad_f - Co)))
        # One-off parameter fold (independent of x): W_eff[(j,ci),(n,co)] = adj[n,j]*th[ci,co]
        w_eff = (jnp.einsum("nj,ic->jinc", adj.astype(jnp.float32),
                            th_p.astype(jnp.float32))
                 .reshape(K, Mf).astype(cdt))
        x_flat = x.reshape(S, K)                     # contiguous merge, free

        row_in = K * (2 * xb + cb)                   # 2 DMA buffers + in-kernel cast copy
        row_out = Mf * (2 * ob + 4)                  # 2 DMA buffers + f32 matmul result
        s_pad, bs, grid_s = _row_tiling(S, row_in, row_out,
                                        2 * fused_w_bytes + slack, budget, n_cores)
        if s_pad > S:
            x_flat = jnp.pad(x_flat, ((0, s_pad - S), (0, 0)))

        out_flat = pl.pallas_call(
            functools.partial(_gc_fused_kernel, act=act, compute_dtype=cdt),
            out_shape=jax.ShapeDtypeStruct((s_pad, Mf), out_dtype),
            grid_spec=pltpu.PrefetchScalarGridSpec(
                num_scalar_prefetch=0,
                grid=(grid_s,),
                in_specs=[
                    pl.BlockSpec((bs, K), lambda s: (s, 0)),
                    pl.BlockSpec((K, Mf), lambda s: (0, 0)),
                ],
                out_specs=pl.BlockSpec((bs, Mf), lambda s: (s, 0)),
            ),
            compiler_params=pltpu.CompilerParams(
                dimension_semantics=("parallel",),
                vmem_limit_bytes=int(budget),
            ),
        )(x_flat, w_eff)

        out = out_flat.reshape(s_pad, N, co_pad_f)[:S, :, :Co]
        return out.reshape(B, T, N, Co)

    # ----------------- unfused path (large shapes: no N^2*Ci*Co weight) ----------
    co128 = _round_up(Co, 128)
    co_pad = co128 if co128 <= 2 * Co else Co        # lane-dense out only when cheap
    th_p = th if co_pad == Co else jnp.pad(th, ((0, 0), (0, co_pad - Co)))
    th_c = th_p.astype(cdt)
    adj_c = adj.astype(cdt)
    nodes_first = Ci <= co_pad                        # minimise total MXU FLOPs

    x3 = x.reshape(S, N, Ci)                          # contiguous merge, free
    row_in = N * Ci * (2 * xb + cb)
    row_out = N * co_pad * (2 * ob + 4)
    resident = 2 * (N * N + Ci * co_pad) * cb + slack
    s_pad, bs, grid_s = _row_tiling(S, row_in, row_out, resident, budget, n_cores)
    if s_pad > S:
        x3 = jnp.pad(x3, ((0, s_pad - S), (0, 0), (0, 0)))

    out3 = pl.pallas_call(
        functools.partial(_gc_unfused_kernel, act=act, compute_dtype=cdt,
                          nodes_first=nodes_first),
        out_shape=jax.ShapeDtypeStruct((s_pad, N, co_pad), out_dtype),
        grid_spec=pltpu.PrefetchScalarGridSpec(
            num_scalar_prefetch=0,
            grid=(grid_s,),
            in_specs=[
                pl.BlockSpec((bs, N, Ci), lambda s: (s, 0, 0)),
                pl.BlockSpec((N, N), lambda s: (0, 0)),
                pl.BlockSpec((Ci, co_pad), lambda s: (0, 0)),
            ],
            out_specs=pl.BlockSpec((bs, N, co_pad), lambda s: (s, 0, 0)),
        ),
        compiler_params=pltpu.CompilerParams(
            dimension_semantics=("parallel",),
            vmem_limit_bytes=int(budget),
        ),
    )(x3, adj_c, th_c)

    out = out3[:S, :, :Co]
    return out.reshape(B, T, N, Co)


# ---------------------------------------------------------------- params (deterministic)
def init_params(key, n_nodes, c_in, c_out):
    ka, kt = jax.random.split(key)
    # normalized adjacency with added self connections (what the module expects as input)
    a = jax.random.uniform(ka, (n_nodes, n_nodes), jnp.float32)
    a = 0.5 * (a + a.T) + jnp.eye(n_nodes, dtype=jnp.float32)
    deg = jnp.sum(a, axis=1)
    dinv = 1.0 / jnp.sqrt(deg)
    adj = dinv[:, None] * a * dinv[None, :]
    # reset_parameters: uniform(-1/sqrt(c_out), 1/sqrt(c_out))
    std = 1.0 / math.sqrt(c_out)
    th = jax.random.uniform(kt, (c_in, c_out), jnp.float32, -std, std)
    return adj, th


# ------------------------------------------------------------- pure-JAX reference (check)
def reference_forward(x, adj, th, act_func=None):
    out = jnp.einsum("ij,kljm->kilm", adj, x)   # (B, N, T, Ci)
    out = out @ th                              # (B, N, T, Co)
    if act_func is not None:
        out = act_func(out)
    return jnp.transpose(out, (0, 2, 1, 3))     # (B, T, N, Co)


if __name__ == "__main__":
    B, T, N, C_IN, C_OUT = 2, 8, 16, 4, 8
    root = jax.random.PRNGKey(0)
    kx, kp = jax.random.split(root)
    x = jax.random.normal(kx, (B, T, N, C_IN), jnp.float32)
    adj, th = init_params(kp, N, C_IN, C_OUT)

    # fused path (default), no activation
    out = jax.block_until_ready(gc_forward(x, adj, th))
    assert out.shape == (B, T, N, C_OUT)
    ref = reference_forward(x, adj, th)
    err = float(jnp.max(jnp.abs(out - ref)))
    assert err < 1e-4, f"fused/no-act mismatch vs reference: {err}"

    # fused path with in-kernel activation (relu)
    out_r = jax.block_until_ready(gc_forward(x, adj, th, act_func=jax.nn.relu))
    ref_r = reference_forward(x, adj, th, act_func=jax.nn.relu)
    err_r = float(jnp.max(jnp.abs(out_r - ref_r)))
    assert err_r < 1e-4, f"fused/relu mismatch vs reference: {err_r}"

    # unfused (large-shape) path, forced via a zero fuse budget, f32
    out_u = jax.block_until_ready(
        gc_forward(x, adj, th, act_func=jax.nn.relu, fuse_weight_limit_bytes=0))
    err_u = float(jnp.max(jnp.abs(out_u - ref_r)))
    assert err_u < 1e-4, f"unfused mismatch vs reference: {err_u}"

    # bf16 MXU inputs with f32 accumulation (production-size option); loose tolerance
    out_b = jax.block_until_ready(gc_forward(x, adj, th, compute_dtype=jnp.bfloat16))
    err_b = float(jnp.max(jnp.abs(out_b - ref)))
    assert err_b < 5e-2, f"bf16 mismatch vs reference: {err_b}"

    print("KERNEL_OK")
</pallas_src>

<mosaic_0001>
module attributes {stable_mosaic.version = 11 : i64} {
  func.func @_gc_fused_kernel(%arg0: i32, %arg1: memref<16x64xf32, #tpu.memory_space<vmem>>, %arg2: memref<64x128xf32, #tpu.memory_space<vmem>>, %arg3: memref<16x128xf32, #tpu.memory_space<vmem>>) attributes {dimension_semantics = [#tpu.dimension_semantics<parallel>], iteration_bounds = array<i64: 1>, scalar_prefetch = 0 : i64, scratch_operands = 0 : i64, tpu.core_type = #tpu.core_type<tc>, window_params = [{transform_indices = @transform_0, window_bounds = array<i64: 16, 64>}, {pipeline_mode = #tpu.pipeline_mode<synchronous>, transform_indices = @transform_1, window_bounds = array<i64: 64, 128>}, {transform_indices = @transform_2, window_bounds = array<i64: 16, 128>}]} {
    %c0 = arith.constant 0 : index
    %c0_0 = arith.constant 0 : index
    %0 = vector.load %arg1[%c0, %c0_0] : memref<16x64xf32, #tpu.memory_space<vmem>>, vector<16x64xf32>
    %c0_1 = arith.constant 0 : index
    %c0_2 = arith.constant 0 : index
    %1 = vector.load %arg2[%c0_1, %c0_2] : memref<64x128xf32, #tpu.memory_space<vmem>>, vector<64x128xf32>
    %cst = arith.constant dense<0.000000e+00> : vector<16x128xf32>
    %2 = tpu.matmul %0, %1, %cst {dimension_numbers = #tpu.dot_dimension_numbers<[1], [0], [0], [1], [0, 0, 1, 1], [], []>} : vector<16x64xf32>, vector<64x128xf32>, vector<16x128xf32> -> vector<16x128xf32>
    %c0_3 = arith.constant 0 : index
    %c0_4 = arith.constant 0 : index
    %3 = vector.load %arg3[%c0_3, %c0_4] : memref<16x128xf32, #tpu.memory_space<vmem>>, vector<16x128xf32>
    tpu.vector_store %arg3[%c0_3, %c0_4], %2 {strides = array<i32>} : memref<16x128xf32, #tpu.memory_space<vmem>>, vector<16x128xf32>,
    return
  }
  func.func @transform_0(%arg0: i32) -> (i32, i32) {
    %c0_i32 = arith.constant 0 : i32
    %c0_i32_0 = arith.constant 0 : i32
    return %arg0, %c0_i32 : i32, i32
  }
  func.func @transform_1(%arg0: i32) -> (i32, i32) {
    %c0_i32 = arith.constant 0 : i32
    %c0_i32_0 = arith.constant 0 : i32
    %c0_i32_1 = arith.constant 0 : i32
    return %c0_i32, %c0_i32_0 : i32, i32
  }
  func.func @transform_2(%arg0: i32) -> (i32, i32) {
    %c0_i32 = arith.constant 0 : i32
    %c0_i32_0 = arith.constant 0 : i32
    return %arg0, %c0_i32 : i32, i32
  }
}

</mosaic_0001>

<bundles_post_ra>
// kernel: tpu_custom_call.1
= control target key start
LH: loop header
LB: loop body
LE: loop exit
PB: predicated region body
PF: predicated region fallthrough
CT: control target
= control target key end

     0   :  { %7 = vsyncpa [#allocation3], 0  ;;  %s294_s0 = inlined_call_operand.hbm [shape: f32[16,64], index: 0, kind: input, shape index: {}]   ;;  %s295_s1 = inlined_call_operand.hbm [shape: f32[64,128], index: 1, kind: input, shape index: {}]   ;;  %s296_s2 = inlined_call_operand.hbm [shape: f32[16,128], index: 2, kind: output, shape index: {}]  }
   0x1   :  { %8 = vsyncpa [#allocation6], 0 }
   0x2   :  { %9 = vsyncpa [#allocation4], 0  ;;  %s254_s9 = smov [#allocation2]  }
   0x3   :  { %s15_s10 = sshll.u32 %s254_s9, 4  ;;  %s16_s10 = int_to_ptr.vmem [resolvable:$true] %s15_s10 }
   0x4   :  { %s196_s11 = scalar_lea.vmem %s16_s10, 256  ;;  %p201_p1 = scmp.lt.s32.totalorder %s16_s10, %s16_s10 }
   0x5   :  { %p197_p0 = scmp.ne.s32.totalorder %s16_s10, %s196_s11  ;;  %p202_p2 = scmp.lt.s32.totalorder %s196_s11, %s196_s11 }
   0x7   :  { %p203_p3 = por %p202_p2, %p201_p1 }
   0x9   :  { %p204_p4 = pnand %p203_p3, %p197_p0 }
   0xb   :  { %207 = shalt.err (!%p204_p4)
}
   0xc   :  { %s255_s12 = smov 128   ;;  %s256_s13 = smov 8  }
   0xd   :  { %21 = dma.hbm_to_vmem [thread:$0]  %s294_s0, 256, %s16_s10, [#allocation3], %s255_s12, %s255_s12, %s256_s13  }
   0xe   :  { %s257_s16 = smov [#allocation5]  }
   0xf   :  { %s27_s17 = sshll.u32 %s257_s16, 4  ;;  %s28_s17 = int_to_ptr.vmem [resolvable:$true] %s27_s17 }
  0x10   :  { %s216_s18 = scalar_lea.vmem %s28_s17, 1024  ;;  %p221_p6 = scmp.lt.s32.totalorder %s28_s17, %s28_s17 }
  0x11   :  { %p217_p5 = scmp.ne.s32.totalorder %s28_s17, %s216_s18  ;;  %p222_p7 = scmp.lt.s32.totalorder %s216_s18, %s216_s18 }
  0x13   :  { %p223_p8 = por %p222_p7, %p221_p6 }
  0x15   :  { %p224_p9 = pnand %p223_p8, %p217_p5 }
  0x17   :  { %227 = shalt.err (!%p224_p9)
}
  0x18   :  { %33 = dma.hbm_to_vmem [thread:$0]  %s295_s1, 1024, %s28_s17, [#allocation6], %s255_s12, %s255_s12, %s256_s13  }
  0x19   :  { %248 = dma.done.wait [#allocation3], 256  }
  0x1a   :  { %249 = vsyncadd [#allocation3], 4294967040 }
  0x1b   :  { %250 = dma.done.wait [#allocation6], 1024  }
  0x1c   :  { %251 = vsyncadd [#allocation6], 4294966272  ;;  %v49_v0 = vld [vmem:[#allocation5 + $0x38] sm:$0xff]  ;;  %v48_v1 = vld [vmem:[#allocation5 + $0x30] sm:$0xff]  ;;  %vm50_vm0 = vcmask 523264   ;;  %s258_s0 = smov [#allocation7]  }
  0x1d   :  { %164 = vmatprep.subr.mxu0 %v49_v0  ;;  %v47_v2 = vld [vmem:[#allocation5 + $0x28] sm:$0xff]  ;;  %v40_v3 = vld [vmem:[#allocation2] sm:$0xff]  ;;  %v46_v4 = vld [vmem:[#allocation5 + $0x20] sm:$0xff]  ;;  %s139_s1 = sshll.u32 %s258_s0, 4  ;;  %s140_s1 = int_to_ptr.vmem [resolvable:$true] %s139_s1 }
  0x1e   :  { %165 = vmatpush3.msra.mxu0 %v49_v0  ;;  %180 = vmatprep.mubr.msk.f32.mxu0 %vm50_vm0, %v40_v3  ;;  %v45_v5 = vld [vmem:[#allocation5 + $0x18] sm:$0xff]  ;;  %v44_v6 = vld [vmem:[#allocation5 + $0x10] sm:$0xff]  ;;  %v43_v7 = vld [vmem:[#allocation5 + $0x8] sm:$0xff]  ;;  %s228_s21 = scalar_lea.vmem %s140_s1, 256  ;;  %p233_p11 = scmp.lt.s32.totalorder %s140_s1, %s140_s1 }
  0x1f   :  { %166 = vmatprep.subr.mxu0 %v48_v1  ;;  %v42_v8 = vld [vmem:[#allocation5] sm:$0xff]  ;;  %v41_v9 = vld [vmem:[#allocation2 + $0x8] sm:$0xff]  ;;  %p229_p10 = scmp.ne.s32.totalorder %s140_s1, %s228_s21  ;;  %p234_p12 = scmp.lt.s32.totalorder %s228_s21, %s228_s21 }
  0x20   :  { %167 = vmatpush3.msra.mxu0 %v48_v1 }
  0x21   :  { %168 = vmatprep.subr.mxu0 %v47_v2  ;;  %p235_p13 = por %p234_p12, %p233_p11 }
  0x22   :  { %169 = vmatpush3.msra.mxu0 %v47_v2 }
  0x23   :  { %170 = vmatprep.subr.mxu0 %v46_v4  ;;  %p236_p0 = pnand %p235_p13, %p229_p10 }
  0x24   :  { %171 = vmatpush3.msra.mxu0 %v46_v4 }
  0x25   :  { %172 = vmatprep.subr.mxu0 %v45_v5 }
  0x26   :  { %173 = vmatpush3.msra.mxu0 %v45_v5 }
  0x27   :  { %174 = vmatprep.subr.mxu0 %v44_v6 }
  0x28   :  { %175 = vmatpush3.msra.mxu0 %v44_v6 }
  0x29   :  { %176 = vmatprep.subr.mxu0 %v43_v7 }
  0x2a   :  { %177 = vmatpush3.msra.mxu0 %v43_v7 }
  0x2b   :  { %178 = vmatprep.subr.mxu0 %v42_v8 }
  0x2c   :  { %179 = vmatpush3.msra.mxu0 %v42_v8 }
  0x2d   :  { %181 = vmatmul.mubr.msk.f32.vlgmr.msra.gmra.mxu0 %vm50_vm0, %v41_v9 }
  0xed   :  { %v182_v10 = vpop.f32.mrf.mxu0 }
  0xee   :  { %133 = vst [vmem:[#allocation7 + $0x8] sm:$0xff] %v182_v10 }
  0xef   :  { %v123_v11 = vpop.f32.mrf.mxu0 }
  0xf0   :  { %132 = vst [vmem:[#allocation7] sm:$0xff] %v123_v11 }
  0xf1   :  { %239 = shalt.err (!%p236_p0)
}
  0xf2   :  { %145 = dma.vmem_to_hbm [thread:$0]  %s140_s1, 256, %s296_s2, [#allocation4], %s255_s12, %s255_s12, %s256_s13  }
  0xf3   :  { %252 = dma.done.wait [#allocation4], 256  }
  0xf4   :  { %253 = vsyncadd [#allocation4], 4294967040 }
  0xf5   :  { %149 = vsyncpa [#allocation3], 1 }
  0xf6   :  { %150 = vsyncpa [#allocation6], 1 }
  0xf7   :  { %151 = vsyncpa [#allocation4], 1 }

</bundles_post_ra>
